<compile_context>
chip_gen: v6e
topology: v6e:2x2x1
jax: 0.10.0
libtpu: 0.0.40
codegen_flags: <defaults>
</compile_context>

<pallas_src>
import jax
import jax.numpy as jnp
from jax import lax
from jax.experimental import pallas as pl
from jax.experimental.pallas import tpu as pltpu


def _embedding_gather_kernel(idx_ref, table_hbm, out_ref, copy_sem):
    # idx_ref:   (N_pad,) int32 in SMEM  -- all token ids (scalar prefetch)
    # table_hbm: (V, D)   float  in HBM  -- embedding table, never copied whole
    # out_ref:   (T, D)   float  in VMEM -- output block for this grid step
    # copy_sem:  DMA semaphore shared by the T row copies of this step
    tile_tokens = out_ref.shape[0]
    base = pl.program_id(0) * tile_tokens

    def issue(t, carry):
        row = idx_ref[base + t]
        pltpu.make_async_copy(
            table_hbm.at[pl.ds(row, 1), :],   # one (1, D) table row in HBM
            out_ref.at[pl.ds(t, 1), :],       # its slot in the output block
            copy_sem,
        ).start()
        return carry

    lax.fori_loop(0, tile_tokens, issue, 0)

    def drain(t, carry):
        # Wait descriptor has the same (1, D) shape as each issued copy, so
        # T waits exactly balance the T starts on the shared semaphore.
        pltpu.make_async_copy(
            table_hbm.at[pl.ds(0, 1), :],
            out_ref.at[pl.ds(0, 1), :],
            copy_sem,
        ).wait()
        return carry

    lax.fori_loop(0, tile_tokens, drain, 0)


def embedding_forward(x, table, *, tile_tokens=256):
    """x: int (B, S) token ids; table: (V, D). Returns (B, S, D) in table.dtype."""
    B, S = x.shape
    V, D = table.shape
    N = B * S

    n_tiles = pl.cdiv(N, tile_tokens)
    n_pad = n_tiles * tile_tokens

    # TODO(synk): PyTorch nn.Embedding raises on out-of-range ids; here they are
    # clamped into range (pad tokens use id 0 and are discarded below).
    idx = jnp.clip(x.reshape(N).astype(jnp.int32), 0, V - 1)
    idx = jnp.pad(idx, (0, n_pad - N))

    out_flat = pl.pallas_call(
        _embedding_gather_kernel,
        out_shape=jax.ShapeDtypeStruct((n_pad, D), table.dtype),
        grid_spec=pltpu.PrefetchScalarGridSpec(
            num_scalar_prefetch=1,                          # idx -> SMEM
            grid=(n_tiles,),
            in_specs=[pl.BlockSpec(memory_space=pl.ANY)],   # table stays in HBM
            out_specs=pl.BlockSpec((tile_tokens, D), lambda i, idx_ref: (i, 0)),
            scratch_shapes=[pltpu.SemaphoreType.DMA],
        ),
        compiler_params=pltpu.CompilerParams(
            dimension_semantics=("parallel",)),
    )(idx, table)

    return out_flat[:N].reshape(B, S, D)


if __name__ == "__main__":
    # Small shapes consistent with the module: batch=2, seq=8, vocab=64, embed=32.
    vocab_size = 64
    embed_dim = 32
    B, S = 2, 8

    key = jax.random.PRNGKey(0)
    k_tab, k_idx = jax.random.split(key)

    # nn.Embedding default init: weights ~ N(0, 1)
    table = jax.random.normal(k_tab, (vocab_size, embed_dim), dtype=jnp.float32)
    x = jax.random.randint(k_idx, (B, S), 0, vocab_size, dtype=jnp.int32)

    out = embedding_forward(x, table)
    out = jax.block_until_ready(out)

    # Correctness check against plain-JAX gather (== nn.Embedding forward).
    ref = table[x]
    assert out.shape == (B, S, embed_dim)
    assert jnp.allclose(out, ref), "mismatch vs reference gather"

    print("KERNEL_OK")
</pallas_src>

<mosaic_0001>
module attributes {stable_mosaic.version = 11 : i64} {
  func.func @_embedding_gather_kernel(%arg0: i32, %arg1: memref<256xi32, #tpu.memory_space<smem>>, %arg2: memref<64x32xf32, #tpu.memory_space<any>>, %arg3: memref<256x32xf32, #tpu.memory_space<vmem>>, %arg4: memref<!tpu.dma_semaphore, #tpu.memory_space<semaphore_mem>>) attributes {dimension_semantics = [#tpu.dimension_semantics<parallel>], iteration_bounds = array<i64: 1>, scalar_prefetch = 1 : i64, scratch_operands = 1 : i64, tpu.core_type = #tpu.core_type<tc>, window_params = [{}, {transform_indices = @transform_1, window_bounds = array<i64: 256, 32>}]} {
    %c256_i32 = arith.constant 256 : i32
    %0 = arith.muli %arg0, %c256_i32 : i32
    %c0_i32 = arith.constant 0 : i32
    %c256_i32_0 = arith.constant 256 : i32
    %1 = arith.addi %c0_i32, %c256_i32_0 : i32
    %c1_i32 = arith.constant 1 : i32
    scf.for %arg5 = %c0_i32 to %1 step %c1_i32  : i32 {
      %3 = arith.addi %0, %arg5 : i32
      %4 = arith.index_cast %3 : i32 to index
      %5 = memref.load %arg1[%4] : memref<256xi32, #tpu.memory_space<smem>>
      %c0_i32_5 = arith.constant 0 : i32
      %6 = tpu.memref_slice %arg2[%5, %c0_i32_5] : memref<64x32xf32, #tpu.memory_space<any>> -> memref<1x32xf32, #tpu.memory_space<any>>
      %c0_i32_6 = arith.constant 0 : i32
      %7 = tpu.memref_slice %arg3[%arg5, %c0_i32_6] : memref<256x32xf32, #tpu.memory_space<vmem>> -> memref<1x32xf32, #tpu.memory_space<vmem>>
      tpu.enqueue_dma source(%6 : memref<1x32xf32, #tpu.memory_space<any>>) target(%7 : memref<1x32xf32, #tpu.memory_space<vmem>>) target_semaphore(%arg4 : memref<!tpu.dma_semaphore, #tpu.memory_space<semaphore_mem>>)
    }
    %c256_i32_1 = arith.constant 256 : i32
    %c0_i32_2 = arith.constant 0 : i32
    %c256_i32_3 = arith.constant 256 : i32
    %2 = arith.addi %c0_i32_2, %c256_i32_3 : i32
    %c1_i32_4 = arith.constant 1 : i32
    scf.for %arg5 = %c0_i32_2 to %2 step %c1_i32_4  : i32 {
      %c0_i32_5 = arith.constant 0 : i32
      %c0_i32_6 = arith.constant 0 : i32
      %3 = tpu.memref_slice %arg2[%c0_i32_5, %c0_i32_6] : memref<64x32xf32, #tpu.memory_space<any>> -> memref<1x32xf32, #tpu.memory_space<any>>
      %c0_i32_7 = arith.constant 0 : i32
      %c0_i32_8 = arith.constant 0 : i32
      %4 = tpu.memref_slice %arg3[%c0_i32_7, %c0_i32_8] : memref<256x32xf32, #tpu.memory_space<vmem>> -> memref<1x32xf32, #tpu.memory_space<vmem>>
      tpu.wait_dma2 semaphore(%arg4 : memref<!tpu.dma_semaphore, #tpu.memory_space<semaphore_mem>>) src(%3 : memref<1x32xf32, #tpu.memory_space<any>>) dst(%4 : memref<1x32xf32, #tpu.memory_space<vmem>>)
    }
    return
  }
  func.func @transform_1(%arg0: i32, %arg1: memref<256xi32, #tpu.memory_space<smem>>) -> (i32, i32) {
    %c0_i32 = arith.constant 0 : i32
    %c0_i32_0 = arith.constant 0 : i32
    return %arg0, %c0_i32 : i32, i32
  }
}

</mosaic_0001>

<bundles_post_ra>
// kernel: tpu_custom_call.1
= control target key start
LH: loop header
LB: loop body
LE: loop exit
PB: predicated region body
PF: predicated region fallthrough
CT: control target
= control target key end

     0   :  { %s186_s0 = inlined_call_operand.vmem [shape: s32[256], index: 0, kind: input, shape index: {}]   ;;  %s187_s1 = inlined_call_operand.vmem [shape: f32[64,32], index: 1, kind: input, shape index: {}]   ;;  %s188_s2 = inlined_call_operand.vmem [shape: f32[256,32], index: 2, kind: output, shape index: {}]  }
   0x1   :  { %s7_s11 = sshll.u32 %s186_s0, 4  ;;  %s8_s11 = int_to_ptr.vmem [resolvable:$true] %s7_s11 }
   0x2   :  { %s129_s12 = scalar_lea.vmem %s8_s11, 32  ;;  %p134_p1 = scmp.lt.s32.totalorder %s8_s11, %s8_s11 }
   0x3   :  { %p130_p0 = scmp.ne.s32.totalorder %s8_s11, %s129_s12  ;;  %p135_p2 = scmp.lt.s32.totalorder %s129_s12, %s129_s12 }
   0x5   :  { %p136_p3 = por %p135_p2, %p134_p1 }
   0x7   :  { %p137_p4 = pnand %p136_p3, %p130_p0 }
   0x9   :  { %140 = shalt.err (!%p137_p4)  }
   0xa   :  { %s161_s13 = smov [#allocation4]  }
   0xb   :  { %10 = dma.vmem_to_smem %s8_s11, 32, %s161_s13, [#allocation3] }
   0xc   :  { %149 = dma.done.wait [#allocation3], 32 }
   0xd   :  { %150 = vsyncadd [#allocation3], 4294967264 }
   0xe   :  { %12 = sfence }
   0xf   :  { %s153_s14 = smov 0  }
  0x10 LB: > { %s21_s15 = sld [smem:[#allocation4 + %s155_s14]]  ;;  %s23_s17 = scalar_lea.vmem %s188_s2, %s155_s14  ;;  %s155_s14 = sphi %s153_s14, %s19_s14  }
  0x16   : > { %s22_s20 = scalar_lea.vmem %s187_s1, %s21_s15 }
  0x17   : > { %v42_v0 = vld [vmem:[%s22_s20] sm:$0x1] }
  0x18   : > { %43 = vst [vmem:[%s23_s17] sm:$0x1] %v42_v0 }
  0x19   : > { %69 = vsyncadd [#allocation2], 16  ;;  %s19_s14 = sadd.s32 1, %s155_s14  }
  0x1a   : > { %p16_p5 = scmp.ge.s32.totalorder %s19_s14, 256  }
  0x1b   :  { %s157_s21 = smov (%p16_p5), 0  }
  0x1c   :  { %18 = sbr.rel (!%p16_p5) target bundleno = 16 (0x10), region = 76 }
  0x21 LB: > { %151 = dma.done.wait [#allocation2], 16  ;;  %s159_s21 = sphi %s157_s21, %s75_s21  }
  0x22   : > { %152 = vsyncadd [#allocation2], 4294967280  ;;  %s75_s21 = sadd.s32 1, %s159_s21  }
  0x23   : > { %p72_p6 = scmp.ge.s32.totalorder %s75_s21, 256  }
  0x25   :  { %74 = sbr.rel (!%p72_p6) target bundleno = 33 (0x21), region = 87 }
  0x2a   :  { %83 = vsyncmov [#allocation2] }
  0x2d   :  { %s84_s22 = vpop.sfrf %83 }
  0x2e   :  { %p111_p7 = scmp.ne.s32.totalorder %s84_s22, 0 }
  0x30   :  { %88 = shalt.err (%p111_p7)  }

</bundles_post_ra>
